<compile_context>
chip_gen: v6e
topology: v6e:2x2x1
jax: 0.10.0
libtpu: 0.0.40
codegen_flags: <defaults>
</compile_context>

<pallas_src>
import math

import jax
import jax.numpy as jnp
from jax.experimental import pallas as pl
from jax.experimental.pallas import tpu as pltpu

_LANE = 128

# Per-block byte budget for the x tile.  Pipelined footprint is ~4x this
# (double-buffered input + output blocks); 6 MiB -> ~24 MiB, explicitly covered
# by the vmem_limit below (fits v5e/v6e/v7x physical VMEM with headroom).
_BLOCK_BYTES_BUDGET = 6 * 1024 * 1024
_VMEM_LIMIT_BYTES = 32 * 1024 * 1024
# Below this, plain XLA `x + bias` beats any pallas_call launch.
_FAST_PATH_BYTES = 128 * 1024
# Force at least this many grid steps when the tensor is big enough to benefit.
_MIN_PIPELINE_STEPS = 4
_MIN_PIPELINE_BYTES = 512 * 1024


def _sublane_multiple(dtype):
    """Row granularity: 8 for 4-byte, 16 for 2-byte, 32 for 1-byte dtypes."""
    itemsize = jnp.dtype(dtype).itemsize
    return 8 * max(1, 4 // itemsize)


def _choose_row_tile(num_rows, num_lanes, dtype):
    """Pick a row tile.

    Budget-driven, dtype-aware sublane rounding, prefers an exact divisor of
    num_rows (no wrapper-side padding) and enforces >= _MIN_PIPELINE_STEPS grid
    steps for tensors large enough to pipeline.  Returns (tile_rows, needs_pad).
    """
    itemsize = jnp.dtype(dtype).itemsize
    sub = _sublane_multiple(dtype)
    row_bytes = num_lanes * itemsize
    total_bytes = num_rows * row_bytes

    budget_rows = max(sub, (_BLOCK_BYTES_BUDGET // max(row_bytes, 1)) // sub * sub)
    target = min(num_rows, budget_rows)
    if total_bytes > _MIN_PIPELINE_BYTES:
        pipeline_cap = max(sub, (num_rows // _MIN_PIPELINE_STEPS) // sub * sub)
        target = min(target, pipeline_cap)

    # Largest sublane-multiple tile that divides num_rows exactly -> no padding.
    start = (target // sub) * sub
    for tr in range(start, 0, -sub):
        if num_rows % tr == 0:
            return tr, False

    # No clean divisor: small/awkward row counts become one full-extent block
    # (full-dim blocks are always legal); otherwise fall back to row padding.
    if num_rows <= target:
        return num_rows, False
    return max(sub, start), True


def _add_bias_kernel(x_ref, b_ref, o_ref):
    # b_ref is either (1, L) (broadcast over rows) or (TR, 1) (broadcast over
    # lanes); jnp broadcasting handles both with a single VPU add.
    o_ref[...] = x_ref[...] + b_ref[...]


def _add_bias_rows(x2d, b2d):
    """y[r, l] = x2d[r, l] + bias.

    bias is a (1, L) row (broadcast over rows, resident in VMEM across grid
    steps) or an (R, 1) column (per-row scalar, tiny per-step DMA).
    """
    R, L = x2d.shape
    bias_per_row = b2d.shape[1] == 1

    tr, needs_pad = _choose_row_tile(R, L, x2d.dtype)
    r_pad = R
    if needs_pad:
        # Only for ragged row counts with no clean divisor (extra HBM pass).
        r_pad = pl.cdiv(R, tr) * tr
        x2d = jnp.pad(x2d, ((0, r_pad - R), (0, 0)))
        if bias_per_row:
            b2d = jnp.pad(b2d, ((0, r_pad - R), (0, 0)))

    if bias_per_row:
        b_spec = pl.BlockSpec((tr, 1), lambda i: (i, 0))
    else:
        b_spec = pl.BlockSpec((1, L), lambda i: (0, 0))  # resident across steps

    out = pl.pallas_call(
        _add_bias_kernel,
        out_shape=jax.ShapeDtypeStruct((r_pad, L), x2d.dtype),
        grid_spec=pltpu.PrefetchScalarGridSpec(
            num_scalar_prefetch=0,
            grid=(r_pad // tr,),
            in_specs=[
                pl.BlockSpec((tr, L), lambda i: (i, 0)),
                b_spec,
            ],
            out_specs=pl.BlockSpec((tr, L), lambda i: (i, 0)),
        ),
        compiler_params=pltpu.CompilerParams(
            dimension_semantics=("parallel",),
            vmem_limit_bytes=_VMEM_LIMIT_BYTES,
        ),
    )(x2d, b2d)

    return out[:R] if r_pad != R else out


def add_bias(x, bias_vec, *, use_pallas=None):
    """Pallas equivalent of AddBias.forward.  bias_vec has shape (C,)."""
    b = jnp.asarray(bias_vec).reshape(-1).astype(x.dtype)

    if x.ndim == 2:
        ref_bias = b.reshape(1, -1)
    elif x.ndim == 4:
        ref_bias = b.reshape(1, -1, 1, 1)
    else:
        raise ValueError(f"AddBias expects 2-D or 4-D input, got shape {x.shape}")

    total_bytes = x.size * jnp.dtype(x.dtype).itemsize
    if use_pallas is None:
        use_pallas = total_bytes >= _FAST_PATH_BYTES
    if not use_pallas:
        # Tiny tensors: kernel launch / re-layout overhead dominates.
        return x + ref_bias

    if x.ndim == 2:
        B, D = x.shape
        if D >= _LANE:
            # Lanes already wide.  If D % 128 != 0 only the tail vreg is
            # masked, which is cheaper than re-laying-out the whole tensor.
            return _add_bias_rows(x, b.reshape(1, D))

        # Lane-densify: group G = lcm(D,128)/D rows so each packed row is a
        # full multiple of 128 lanes; lane j always carries channel j % D, so a
        # single pre-tiled resident bias row is exact.
        L = (D * _LANE) // math.gcd(D, _LANE)
        G = L // D
        b_row = jnp.tile(b, G).reshape(1, L)
        if B % G == 0:
            # Free (contiguous) reshape -> no extra HBM pass.
            out = _add_bias_rows(x.reshape(B // G, L), b_row)
            return out.reshape(B, D)
        # Ragged batch: pad the flattened tensor to whole packed rows (one
        # extra HBM pass; only triggers on awkward batch sizes).
        n = B * D
        n_pad = pl.cdiv(n, L) * L
        flat = jnp.pad(x.reshape(n), (0, n_pad - n))
        out = _add_bias_rows(flat.reshape(n_pad // L, L), b_row)
        return out.reshape(n_pad)[:n].reshape(B, D)

    # 4-D NCHW + bias.view(1, C, 1, 1)
    N, C, H, W = x.shape
    hw = H * W
    if hw >= _LANE:
        # rows = (n, c) pairs, lanes = H*W (lane-dense); bias is a per-row
        # scalar column (tiny per-step DMA).
        x2d = x.reshape(N * C, hw)
        b2d = jnp.tile(b, N).reshape(N * C, 1)
        out = _add_bias_rows(x2d, b2d)
    else:
        # Small feature maps: rows = samples, lanes = C*H*W so the store path
        # stays wide; bias is a single resident repeat(b, H*W) row.
        # TODO(synk): if C*H*W < 128 and N is huge, group samples per row as in
        # the 2-D lane-densify path to avoid masked stores.
        x2d = x.reshape(N, C * hw)
        b2d = jnp.repeat(b, hw).reshape(1, C * hw)
        out = _add_bias_rows(x2d, b2d)
    return out.reshape(N, C, H, W)


class AddBiasJax:
    """JAX/Pallas counterpart of AddBias(nn.Module)."""

    def __init__(self, bias):
        # Mirrors nn.Parameter(bias.unsqueeze(1)): stored as (C, 1).
        self._bias = jnp.asarray(bias, dtype=jnp.float32).reshape(-1, 1)

    def __call__(self, x, use_pallas=None):
        return add_bias(x, self._bias.reshape(-1), use_pallas=use_pallas)


if __name__ == "__main__":
    key = jax.random.PRNGKey(0)
    k1, k2, k3, k4 = jax.random.split(key, 4)

    num_features = 4
    bias = jax.random.normal(k1, (num_features,), dtype=jnp.float32)
    layer = AddBiasJax(bias)

    # 2-D branch (B, C): B % (128 // C) == 0 -> clean lane-dense path, no pads.
    x2d = jax.random.normal(k2, (256, num_features), dtype=jnp.float32)
    y2d = layer(x2d, use_pallas=True)

    # 4-D branch (N, C, H, W): H*W = 256 >= 128 -> lane-dense (N*C, H*W) rows.
    x4d = jax.random.normal(k3, (2, num_features, 16, 16), dtype=jnp.float32)
    y4d = layer(x4d, use_pallas=True)

    # Tiny ragged batch exercises the padded fallback and the auto fast path.
    x2d_small = jax.random.normal(k4, (8, num_features), dtype=jnp.float32)
    y2d_small_pallas = layer(x2d_small, use_pallas=True)
    y2d_small_auto = layer(x2d_small)  # auto-routed to plain XLA (tiny tensor)

    jax.block_until_ready((y2d, y4d, y2d_small_pallas, y2d_small_auto))

    ref2d = x2d + bias.reshape(1, -1)
    ref4d = x4d + bias.reshape(1, -1, 1, 1)
    ref2d_small = x2d_small + bias.reshape(1, -1)
    assert jnp.allclose(y2d, ref2d, atol=1e-6), "2-D AddBias mismatch"
    assert jnp.allclose(y4d, ref4d, atol=1e-6), "4-D AddBias mismatch"
    assert jnp.allclose(y2d_small_pallas, ref2d_small, atol=1e-6), "padded-path mismatch"
    assert jnp.allclose(y2d_small_auto, ref2d_small, atol=1e-6), "fast-path mismatch"

    print("KERNEL_OK")
</pallas_src>

<mosaic_0001>
module attributes {stable_mosaic.version = 11 : i64} {
  func.func @_add_bias_kernel(%arg0: i32, %arg1: memref<8x128xf32, #tpu.memory_space<vmem>>, %arg2: memref<1x128xf32, #tpu.memory_space<vmem>>, %arg3: memref<8x128xf32, #tpu.memory_space<vmem>>) attributes {dimension_semantics = [#tpu.dimension_semantics<parallel>], iteration_bounds = array<i64: 1>, scalar_prefetch = 0 : i64, scratch_operands = 0 : i64, tpu.core_type = #tpu.core_type<tc>, window_params = [{transform_indices = @transform_0, window_bounds = array<i64: 8, 128>}, {pipeline_mode = #tpu.pipeline_mode<synchronous>, transform_indices = @transform_1, window_bounds = array<i64: 1, 128>}, {transform_indices = @transform_2, window_bounds = array<i64: 8, 128>}]} {
    %c0 = arith.constant 0 : index
    %c0_0 = arith.constant 0 : index
    %0 = vector.load %arg1[%c0, %c0_0] : memref<8x128xf32, #tpu.memory_space<vmem>>, vector<8x128xf32>
    %c0_1 = arith.constant 0 : index
    %c0_2 = arith.constant 0 : index
    %1 = vector.load %arg2[%c0_1, %c0_2] : memref<1x128xf32, #tpu.memory_space<vmem>>, vector<1x128xf32>
    %2 = vector.broadcast %1 : vector<1x128xf32> to vector<8x128xf32>
    %3 = arith.addf %0, %2 : vector<8x128xf32>
    %c0_3 = arith.constant 0 : index
    %c0_4 = arith.constant 0 : index
    %4 = vector.load %arg3[%c0_3, %c0_4] : memref<8x128xf32, #tpu.memory_space<vmem>>, vector<8x128xf32>
    tpu.vector_store %arg3[%c0_3, %c0_4], %3 {strides = array<i32>} : memref<8x128xf32, #tpu.memory_space<vmem>>, vector<8x128xf32>,
    return
  }
  func.func @transform_0(%arg0: i32) -> (i32, i32) {
    %c0_i32 = arith.constant 0 : i32
    %c0_i32_0 = arith.constant 0 : i32
    return %arg0, %c0_i32 : i32, i32
  }
  func.func @transform_1(%arg0: i32) -> (i32, i32) {
    %c0_i32 = arith.constant 0 : i32
    %c0_i32_0 = arith.constant 0 : i32
    %c0_i32_1 = arith.constant 0 : i32
    return %c0_i32, %c0_i32_0 : i32, i32
  }
  func.func @transform_2(%arg0: i32) -> (i32, i32) {
    %c0_i32 = arith.constant 0 : i32
    %c0_i32_0 = arith.constant 0 : i32
    return %arg0, %c0_i32 : i32, i32
  }
}

</mosaic_0001>

<bundles_post_ra>
// kernel: tpu_custom_call.1
= control target key start
LH: loop header
LB: loop body
LE: loop exit
PB: predicated region body
PF: predicated region fallthrough
CT: control target
= control target key end

     0   :  { %7 = vsyncpa [#allocation3], 0  ;;  %s122_s0 = inlined_call_operand.hbm [shape: f32[8,128], index: 0, kind: input, shape index: {}]   ;;  %s123_s1 = inlined_call_operand.vmem [shape: f32[1,128], index: 1, kind: input, shape index: {}]   ;;  %s124_s2 = inlined_call_operand.hbm [shape: f32[8,128], index: 2, kind: output, shape index: {}]  }
   0x1   :  { %8 = vsyncpa [#allocation4], 0  ;;  %s96_s9 = smov [#allocation2]  }
   0x2   :  { %s15_s10 = sshll.u32 %s96_s9, 4  ;;  %s16_s10 = int_to_ptr.vmem [resolvable:$true] %s15_s10 }
   0x3   :  { %s60_s11 = scalar_lea.vmem %s16_s10, 128  ;;  %p65_p1 = scmp.lt.s32.totalorder %s16_s10, %s16_s10 }
   0x4   :  { %p61_p0 = scmp.ne.s32.totalorder %s16_s10, %s60_s11  ;;  %p66_p2 = scmp.lt.s32.totalorder %s60_s11, %s60_s11 }
   0x6   :  { %p67_p3 = por %p66_p2, %p65_p1 }
   0x8   :  { %p68_p4 = pnand %p67_p3, %p61_p0 }
   0xa   :  { %71 = shalt.err (!%p68_p4)
}
   0xb   :  { %18 = dma.hbm_to_vmem [thread:$0]  %s122_s0, 128, %s16_s10, [#allocation3]  }
   0xc   :  { %92 = dma.done.wait [#allocation3], 128  }
   0xd   :  { %93 = vsyncadd [#allocation3], 4294967168  ;;  %s97_s14 = smov [#allocation5]   ;;  %v24_v0 = vld [vmem:[#allocation2] sm:$0xff] }
   0xe   :  { %s40_s15 = sshll.u32 %s97_s14, 4  ;;  %v49_v1 = vld [vmem:[%s123_s1] ss:$0 sm:$0xff]  ;;  %s41_s15 = int_to_ptr.vmem [resolvable:$true] %s40_s15 }
   0xf   :  { %v32_v2 = vadd.f32 %v49_v1, %v24_v0  ;;  %s72_s18 = scalar_lea.vmem %s41_s15, 128  ;;  %p77_p6 = scmp.lt.s32.totalorder %s41_s15, %s41_s15 }
  0x10   :  { %p73_p5 = scmp.ne.s32.totalorder %s41_s15, %s72_s18  ;;  %p78_p7 = scmp.lt.s32.totalorder %s72_s18, %s72_s18 }
  0x11   :  { %33 = vst [vmem:[#allocation5] sm:$0xff] %v32_v2 }
  0x12   :  { %p79_p8 = por %p78_p7, %p77_p6 }
  0x14   :  { %p80_p9 = pnand %p79_p8, %p73_p5 }
  0x16   :  { %83 = shalt.err (!%p80_p9)
}
  0x17   :  { %43 = dma.vmem_to_hbm [thread:$0]  %s41_s15, 128, %s124_s2, [#allocation4]  }
  0x18   :  { %94 = dma.done.wait [#allocation4], 128  }
  0x19   :  { %95 = vsyncadd [#allocation4], 4294967168 }
  0x1a   :  { %47 = vsyncpa [#allocation3], 1 }
  0x1b   :  { %48 = vsyncpa [#allocation4], 1 }

</bundles_post_ra>
